<compile_context>
chip_gen: v7x
topology: tpu7x:2x2x1
jax: 0.10.0
libtpu: 0.0.40
codegen_flags: <defaults>
</compile_context>

<pallas_src>
import functools

import jax
import jax.numpy as jnp
from jax import lax
from jax.experimental import pallas as pl
from jax.experimental.pallas import tpu as pltpu
import numpy as np

_EPS_COS = 1e-8                      # F.cosine_similarity eps
_INV_EPS_COS = 1e8                   # 1 / eps
_EPS_SIM = 1e-6                      # get_cossim / calc_loss eps
_LOG_EPS_SIM = float(np.log(_EPS_SIM))
_NEG_BIG = -1e30                     # bias for padded classes / running-max init
_MAX_C_TILE = 1024                   # production class-tile upper bound


def _round_up(x, m):
    return (x + m - 1) // m * m


def _class_tiling(n_classes):
    """(num_class_tiles, class_tile, padded_class_count); tile is a multiple of 128."""
    n_ct = max(1, -(-n_classes // _MAX_C_TILE))
    c_tile = _round_up(-(-n_classes // n_ct), 128)
    return n_ct, c_tile, n_ct * c_tile


def prepare_si_head(lin_w, lin_b):
    """One-time SI-head parameter prep — call at model-construction time, NOT per step.

    Transposes the nn.Linear weight (C, E) -> (E, C_pad) and casts to bf16 so the
    kernel's MXU consumes it as a canonical (contraction-on-sublanes) operand with
    half the HBM->VMEM bytes; pads the class axis to a multiple of the class tile
    and gives padded classes a -1e30 bias so they never affect the softmax.
    """
    C, E = lin_w.shape
    _, _, c_pad = _class_tiling(C)
    w_t = jnp.zeros((E, c_pad), jnp.bfloat16)
    w_t = w_t.at[:, :C].set(jnp.asarray(lin_w, jnp.float32).T.astype(jnp.bfloat16))
    b_p = jnp.full((1, c_pad), _NEG_BIG, jnp.float32)
    b_p = b_p.at[:, :C].set(jnp.asarray(lin_b, jnp.float32)[None, :])
    return w_t, b_p


def _hybrid_loss_kernel(x_ref, labels_ref, wb_ref, lin_wt_ref, lin_b_ref,
                        out_ref, l1_sc, m_sc, s_sc, t_sc,
                        *, n_spk, m_utt, nm_valid, c_tile):
    """Grid = (num_class_tiles,).  GE2E runs at step 0; CE is an online logsumexp
    over class tiles; the final scalar loss is written at the last step."""
    c_idx = pl.program_id(0)
    n_ct = pl.num_programs(0)

    x = x_ref[...]                                   # (NM_pad, E) f32, padded rows are 0
    nm = x.shape[0]
    n = n_spk
    m = m_utt

    # validity mask for the sublane-padded rows (they must not bias either loss)
    row_valid = (lax.broadcasted_iota(jnp.int32, (nm, 1), 0)
                 < nm_valid).astype(jnp.float32)                      # (NM_pad, 1)

    # ---------------- step 0: GE2E branch (all f32) + accumulator init ----------
    @pl.when(c_idx == 0)
    def _ge2e_and_init():
        inv_m = 1.0 / m
        inv_m1 = 1.0 / (m - 1)

        # per-row squared norms, computed once and reused for both cosine paths
        x_sq = jnp.sum(x * x, axis=-1, keepdims=True)                 # (NM_pad, 1)

        # same-speaker mask in (NM, N) layout via iota compares (no reshapes);
        # padded rows (r >= N*M) are all-False and contribute nothing.
        row_id = lax.broadcasted_iota(jnp.int32, (nm, n), 0)
        col_id = lax.broadcasted_iota(jnp.int32, (nm, n), 1)
        off = row_id - col_id * m
        same_mask = (off >= 0) & (off < m)                            # (NM_pad, N)

        # transposed group indicator built directly in (N, NM) layout
        row_t = lax.broadcasted_iota(jnp.int32, (n, nm), 1)
        col_t = lax.broadcasted_iota(jnp.int32, (n, nm), 0)
        off_t = row_t - col_t * m
        g_t = ((off_t >= 0) & (off_t < m)).astype(jnp.float32)        # (N, NM_pad)

        spk_sum = lax.dot_general(g_t, x, (((1,), (0,)), ((), ())),
                                  preferred_element_type=jnp.float32)  # (N, E)
        centroids = spk_sum * inv_m
        cen_sq = jnp.sum(centroids * centroids, axis=-1)[None, :]      # (1, N)

        # tiny (N, E) rhs contracted on lanes; any relayout is negligible at batch-N.
        dots = lax.dot_general(x, centroids, (((1,), (1,)), ((), ())),
                               preferred_element_type=jnp.float32)     # (NM_pad, N)

        # PyTorch F.cosine_similarity clamps each norm separately: 1/max(||.||, eps)
        inv_xn = jnp.minimum(lax.rsqrt(x_sq), _INV_EPS_COS)            # (NM_pad, 1)
        inv_cn = jnp.minimum(lax.rsqrt(cen_sq), _INV_EPS_COS)          # (1, N)
        cos_diff = dots * inv_xn * inv_cn                              # (NM_pad, N)

        # Leave-one-out cosine derived algebraically from existing dot products:
        #   utt_centroid_r = (spk_sum[s] - x_r) / (M-1),  s = speaker(r)
        d_same = jnp.sum(jnp.where(same_mask, dots, 0.0),
                         axis=-1, keepdims=True)                       # (NM_pad, 1)
        c_same = jnp.sum(jnp.where(same_mask, cen_sq, 0.0),
                         axis=-1, keepdims=True)                       # (NM_pad, 1)
        w12 = (m * d_same - x_sq) * inv_m1
        # clamp >= 0: f32 cancellation can make this slightly negative
        uc_sq = jnp.maximum((m * m * c_same - 2.0 * m * d_same + x_sq)
                            * (inv_m1 * inv_m1), 0.0)
        inv_un = jnp.minimum(lax.rsqrt(uc_sq), _INV_EPS_COS)
        cos_same = w12 * inv_xn * inv_un                               # (NM_pad, 1)

        w = wb_ref[0]
        b = wb_ref[1]
        # positive term computed directly as an (NM, 1) expression (no masked reduce)
        pos = w * (cos_same + _EPS_SIM) + b                            # (NM_pad, 1)
        # full sim matrix only needed for the negative logsumexp term
        cossim = jnp.where(same_mask, cos_same, cos_diff) + _EPS_SIM
        sim = w * cossim + b                                           # (NM_pad, N)

        mm = jnp.maximum(jnp.max(sim, axis=-1, keepdims=True), _LOG_EPS_SIM)
        neg = mm + jnp.log(jnp.sum(jnp.exp(sim - mm), axis=-1, keepdims=True)
                           + jnp.exp(_LOG_EPS_SIM - mm))               # (NM_pad, 1)
        l1_sc[0, 0] = jnp.sum((neg - pos) * row_valid)

        # init online-logsumexp accumulators for the CE branch
        m_sc[...] = jnp.full((nm, 1), _NEG_BIG, jnp.float32)
        s_sc[...] = jnp.zeros((nm, 1), jnp.float32)
        t_sc[...] = jnp.zeros((nm, 1), jnp.float32)

    # ---------------- CE class tile: online logsumexp (every step) --------------
    # bf16 MXU operands (weight already bf16 from prepare_si_head), f32 accumulation.
    # TODO(synk): on v6e/v7x the exp below could use a bf16 EUP path for ~2x
    # transcendental throughput; kept f32 for v5e compatibility / accuracy.
    logits = lax.dot_general(x.astype(jnp.bfloat16), lin_wt_ref[...],
                             (((1,), (0,)), ((), ())),
                             preferred_element_type=jnp.float32) + lin_b_ref[...]
    tile_max = jnp.max(logits, axis=-1, keepdims=True)                 # (NM_pad, 1)
    m_prev = m_sc[...]
    m_new = jnp.maximum(m_prev, tile_max)
    s_sc[...] = s_sc[...] * jnp.exp(m_prev - m_new) + \
        jnp.sum(jnp.exp(logits - m_new), axis=-1, keepdims=True)
    m_sc[...] = m_new

    # target logit: each row's label falls in exactly one class tile
    col = lax.broadcasted_iota(jnp.int32, logits.shape, 1) + c_idx * c_tile
    tgt_mask = col == labels_ref[...]                                  # (NM_pad, c_tile)
    t_sc[...] = t_sc[...] + jnp.sum(jnp.where(tgt_mask, logits, 0.0),
                                    axis=-1, keepdims=True)

    # ---------------- last step: finalize ---------------------------------------
    @pl.when(c_idx == n_ct - 1)
    def _finalize():
        lse = m_sc[...] + jnp.log(s_sc[...])                           # (NM_pad, 1)
        ce = (lse - t_sc[...]) * row_valid
        out_ref[0, 0] = l1_sc[0, 0] + jnp.sum(ce) * (1.0 / nm_valid)


@jax.jit
def hybrid_loss(emb, y, w, b, lin_w_t, lin_b_p):
    """emb: (N, M, E) f32; y: (N,) int32 labels in [0, C); w, b: GE2E scalars;
    lin_w_t, lin_b_p: SI head params prepared once by prepare_si_head()."""
    N, M, E = emb.shape
    if M < 2:
        raise ValueError("GE2E leave-one-out centroids require M >= 2")
    NM = N * M
    NM_pad = _round_up(NM, 16)            # bf16 sublane granule for the CE matmul lhs
    C_pad = lin_w_t.shape[1]
    n_ct, c_tile, c_pad_chk = _class_tiling(C_pad)
    if c_pad_chk != C_pad:
        raise ValueError("lin_w_t / lin_b_p must come from prepare_si_head()")

    # Flatten / sublane-pad OUTSIDE the kernel (no in-kernel reshapes); no lane
    # padding of E — the MXU handles a short contraction dim at no extra cost.
    x_flat = emb.reshape(NM, E).astype(jnp.float32)
    x_flat = jnp.pad(x_flat, ((0, NM_pad - NM), (0, 0)))
    labels = jnp.repeat(y.astype(jnp.int32), M)          # repeat_interleave(M)
    labels = jnp.pad(labels, (0, NM_pad - NM)).reshape(NM_pad, 1)
    wb = jnp.stack([jnp.asarray(w, jnp.float32), jnp.asarray(b, jnp.float32)])

    # Scoped-VMEM budget from actual residency (resident x/labels, double-buffered
    # weight/bias tiles, logits + softmax temporaries, GE2E temporaries).
    est_bytes = (NM_pad * E * 4 + NM_pad * 4
                 + 2 * (E * c_tile * 2 + c_tile * 4)
                 + 4 * NM_pad * c_tile * 4
                 + 8 * NM_pad * max(N, 8) * 4
                 + 16 * NM_pad * 4)
    vmem_limit = int(min(max(2 * est_bytes, 16 << 20), 32 << 20))

    # TODO(synk): on v7x (2 TensorCores) add a "parallel" row-tile axis with
    # per-tile partial losses reduced outside; single-core is fine on v5e/v6e.
    kernel = functools.partial(_hybrid_loss_kernel, n_spk=N, m_utt=M,
                               nm_valid=NM, c_tile=c_tile)
    out = pl.pallas_call(
        kernel,
        out_shape=jax.ShapeDtypeStruct((1, 1), jnp.float32),
        grid_spec=pltpu.PrefetchScalarGridSpec(
            num_scalar_prefetch=0,
            grid=(n_ct,),
            in_specs=[
                pl.BlockSpec(memory_space=pltpu.MemorySpace.VMEM),  # x (NM_pad, E)
                pl.BlockSpec(memory_space=pltpu.MemorySpace.VMEM),  # labels (NM_pad, 1)
                pl.BlockSpec(memory_space=pltpu.MemorySpace.SMEM),  # [w, b]
                pl.BlockSpec((E, c_tile), lambda c: (0, c)),        # bf16 weight tile
                pl.BlockSpec((1, c_tile), lambda c: (0, c)),        # f32 bias tile
            ],
            out_specs=pl.BlockSpec(memory_space=pltpu.MemorySpace.SMEM),
            scratch_shapes=[
                pltpu.SMEM((1, 1), jnp.float32),          # GE2E partial loss
                pltpu.VMEM((NM_pad, 1), jnp.float32),     # running max
                pltpu.VMEM((NM_pad, 1), jnp.float32),     # running sum-exp
                pltpu.VMEM((NM_pad, 1), jnp.float32),     # target logit
            ]),
        compiler_params=pltpu.CompilerParams(
            dimension_semantics=("arbitrary",),
            vmem_limit_bytes=vmem_limit),
    )(x_flat, labels, wb, lin_w_t, lin_b_p)
    return out[0, 0]


def hybrid_loss_ref(emb, y, w, b, lin_w, lin_b):
    """Pure-JAX reference mirroring the PyTorch semantics."""
    N, M, E = emb.shape
    centroids = emb.mean(axis=1)
    utt_c = (emb.sum(axis=1, keepdims=True) - emb) / (M - 1)

    def cos(a, b_, axis):
        num = jnp.sum(a * b_, axis=axis)
        na = jnp.maximum(jnp.sqrt(jnp.sum(a * a, axis=axis)), _EPS_COS)
        nb = jnp.maximum(jnp.sqrt(jnp.sum(b_ * b_, axis=axis)), _EPS_COS)
        return num / (na * nb)

    cos_same = cos(emb, utt_c, -1)                                       # (N, M)
    cos_diff = cos(emb[:, :, None, :], centroids[None, None, :, :], -1)  # (N, M, N)
    eye = jnp.eye(N, dtype=bool)[:, None, :]
    cossim = jnp.where(eye, cos_same[:, :, None], cos_diff) + _EPS_SIM
    sim = w * cossim + b
    pos = jnp.sum(jnp.where(eye, sim, 0.0), axis=2)
    neg = jnp.log(jnp.sum(jnp.exp(sim), axis=2) + _EPS_SIM)
    l1 = jnp.sum(-(pos - neg))

    x_flat = emb.reshape(N * M, E)
    logits = x_flat @ lin_w.T + lin_b
    labels = jnp.repeat(y, M)
    logprobs = jax.nn.log_softmax(logits, axis=-1)
    l2 = -jnp.mean(logprobs[jnp.arange(N * M), labels])
    return l1 + l2


if __name__ == "__main__":
    # Small shapes consistent with GE2E: N speakers, M utterances each, emb_size E.
    N, M, E, C = 4, 5, 32, 16   # C = num_of_spks for the SI linear head

    key = jax.random.PRNGKey(0)
    k_emb, k_y, k_w, k_b = jax.random.split(key, 4)

    embeddings = jax.random.normal(k_emb, (N, M, E), dtype=jnp.float32)
    y = jax.random.randint(k_y, (N,), 0, C, dtype=jnp.int32)

    # GE2E learnable scalars (as in nn.Parameter init)
    w_ge2e = jnp.float32(10.0)
    b_ge2e = jnp.float32(-5.0)

    # nn.Linear(emb_size, num_of_spks): weight (C, E), bias (C,)
    bound = 1.0 / np.sqrt(E)
    lin_w = jax.random.uniform(k_w, (C, E), jnp.float32, -bound, bound)
    lin_b = jax.random.uniform(k_b, (C,), jnp.float32, -bound, bound)

    # One-time parameter prep (bf16, transposed, class-padded) — done outside the step.
    lin_w_t, lin_b_p = prepare_si_head(lin_w, lin_b)

    loss = hybrid_loss(embeddings, y, w_ge2e, b_ge2e, lin_w_t, lin_b_p)
    loss = jax.block_until_ready(loss)

    loss_ref = hybrid_loss_ref(embeddings, y, w_ge2e, b_ge2e, lin_w, lin_b)
    # tolerance accommodates the bf16-operand (f32-accumulate) CE matmul
    np.testing.assert_allclose(np.asarray(loss), np.asarray(loss_ref),
                               rtol=1e-3, atol=1e-3)
    print("KERNEL_OK")
</pallas_src>

<mosaic_0001>
module attributes {stable_mosaic.version = 11 : i64} {
  func.func @_hybrid_loss_kernel(%arg0: i32, %arg1: memref<32x32xf32, #tpu.memory_space<vmem>>, %arg2: memref<32x1xi32, #tpu.memory_space<vmem>>, %arg3: memref<2xf32, #tpu.memory_space<smem>>, %arg4: memref<32x128xbf16, #tpu.memory_space<vmem>>, %arg5: memref<1x128xf32, #tpu.memory_space<vmem>>, %arg6: memref<1x1xf32, #tpu.memory_space<smem>>, %arg7: memref<1x1xf32, #tpu.memory_space<smem>>, %arg8: memref<32x1xf32, #tpu.memory_space<vmem>>, %arg9: memref<32x1xf32, #tpu.memory_space<vmem>>, %arg10: memref<32x1xf32, #tpu.memory_space<vmem>>) attributes {dimension_semantics = [#tpu.dimension_semantics<arbitrary>], iteration_bounds = array<i64: 1>, scalar_prefetch = 0 : i64, scratch_operands = 4 : i64, tpu.core_type = #tpu.core_type<tc>, window_params = [{pipeline_mode = #tpu.pipeline_mode<synchronous>, transform_indices = @transform_0, window_bounds = array<i64: 32, 32>}, {pipeline_mode = #tpu.pipeline_mode<synchronous>, transform_indices = @transform_1, window_bounds = array<i64: 32, 1>}, {transform_indices = @transform_2, window_bounds = array<i64: 2>}, {transform_indices = @transform_3, window_bounds = array<i64: 32, 128>}, {transform_indices = @transform_4, window_bounds = array<i64: 1, 128>}, {transform_indices = @transform_5, window_bounds = array<i64: 1, 1>}]} {
    %c0 = arith.constant 0 : index
    %c0_0 = arith.constant 0 : index
    %0 = vector.load %arg1[%c0, %c0_0] : memref<32x32xf32, #tpu.memory_space<vmem>>, vector<32x32xf32>
    %1 = tpu.iota {dimensions = array<i32: 0>} : vector<32x1xi32>
    %c20_i32 = arith.constant 20 : i32
    %2 = vector.broadcast %c20_i32 : i32 to vector<32x1xi32>
    %3 = arith.cmpi slt, %1, %2 : vector<32x1xi32>
    %4 = arith.extui %3 : vector<32x1xi1> to vector<32x1xi32>
    %5 = arith.sitofp %4 : vector<32x1xi32> to vector<32x1xf32>
    %c0_i32 = arith.constant 0 : i32
    %6 = arith.cmpi eq, %arg0, %c0_i32 : i32
    %7 = arith.extui %6 : i1 to i32
    %c0_i32_1 = arith.constant 0 : i32
    %8 = arith.cmpi ne, %7, %c0_i32_1 : i32
    scf.if %8 {
      %48 = arith.mulf %0, %0 : vector<32x32xf32>
      %cst_26 = arith.constant dense<0.000000e+00> : vector<32xf32>
      %49 = vector.multi_reduction <add>, %48, %cst_26 [1] : vector<32x32xf32> to vector<32xf32>
      %50 = vector.shape_cast %49 : vector<32xf32> to vector<32x1xf32>
      %51 = tpu.iota {dimensions = array<i32: 0>} : vector<32x4xi32>
      %52 = tpu.iota {dimensions = array<i32: 1>} : vector<32x4xi32>
      %c5_i32 = arith.constant 5 : i32
      %53 = vector.broadcast %c5_i32 : i32 to vector<32x4xi32>
      %54 = arith.muli %52, %53 : vector<32x4xi32>
      %55 = arith.subi %51, %54 : vector<32x4xi32>
      %c0_i32_27 = arith.constant 0 : i32
      %56 = vector.broadcast %c0_i32_27 : i32 to vector<32x4xi32>
      %57 = arith.cmpi sge, %55, %56 : vector<32x4xi32>
      %c5_i32_28 = arith.constant 5 : i32
      %58 = vector.broadcast %c5_i32_28 : i32 to vector<32x4xi32>
      %59 = arith.cmpi slt, %55, %58 : vector<32x4xi32>
      %60 = arith.andi %57, %59 : vector<32x4xi1>
      %61 = tpu.iota {dimensions = array<i32: 1>} : vector<4x32xi32>
      %62 = tpu.iota {dimensions = array<i32: 0>} : vector<4x32xi32>
      %c5_i32_29 = arith.constant 5 : i32
      %63 = vector.broadcast %c5_i32_29 : i32 to vector<4x32xi32>
      %64 = arith.muli %62, %63 : vector<4x32xi32>
      %65 = arith.subi %61, %64 : vector<4x32xi32>
      %c0_i32_30 = arith.constant 0 : i32
      %66 = vector.broadcast %c0_i32_30 : i32 to vector<4x32xi32>
      %67 = arith.cmpi sge, %65, %66 : vector<4x32xi32>
      %c5_i32_31 = arith.constant 5 : i32
      %68 = vector.broadcast %c5_i32_31 : i32 to vector<4x32xi32>
      %69 = arith.cmpi slt, %65, %68 : vector<4x32xi32>
      %70 = arith.andi %67, %69 : vector<4x32xi1>
      %71 = arith.extui %70 : vector<4x32xi1> to vector<4x32xi32>
      %72 = arith.sitofp %71 : vector<4x32xi32> to vector<4x32xf32>
      %cst_32 = arith.constant dense<0.000000e+00> : vector<4x32xf32>
      %73 = tpu.matmul %72, %0, %cst_32 {dimension_numbers = #tpu.dot_dimension_numbers<[1], [0], [0], [1], [0, 0, 1, 1], [], []>} : vector<4x32xf32>, vector<32x32xf32>, vector<4x32xf32> -> vector<4x32xf32>
      %cst_33 = arith.constant 2.000000e-01 : f32
      %74 = vector.broadcast %cst_33 : f32 to vector<4x32xf32>
      %75 = arith.mulf %73, %74 : vector<4x32xf32>
      %76 = arith.mulf %75, %75 : vector<4x32xf32>
      %cst_34 = arith.constant dense<0.000000e+00> : vector<4xf32>
      %77 = vector.multi_reduction <add>, %76, %cst_34 [1] : vector<4x32xf32> to vector<4xf32>
      %78 = vector.shape_cast %77 : vector<4xf32> to vector<1x4xf32>
      %cst_35 = arith.constant dense<0.000000e+00> : vector<32x4xf32>
      %79 = tpu.matmul %0, %75, %cst_35 {dimension_numbers = #tpu.dot_dimension_numbers<[1], [1], [0], [0], [0, 0, 1, 0], [], []>} : vector<32x32xf32>, vector<4x32xf32>, vector<32x4xf32> -> vector<32x4xf32>
      %80 = math.rsqrt %50 : vector<32x1xf32>
      %cst_36 = arith.constant 1.000000e+08 : f32
      %81 = vector.broadcast %cst_36 : f32 to vector<32x1xf32>
      %82 = arith.minimumf %80, %81 : vector<32x1xf32>
      %83 = math.rsqrt %78 : vector<1x4xf32>
      %cst_37 = arith.constant 1.000000e+08 : f32
      %84 = vector.broadcast %cst_37 : f32 to vector<1x4xf32>
      %85 = arith.minimumf %83, %84 : vector<1x4xf32>
      %86 = vector.broadcast %82 : vector<32x1xf32> to vector<32x4xf32>
      %87 = arith.mulf %79, %86 : vector<32x4xf32>
      %88 = vector.broadcast %85 : vector<1x4xf32> to vector<32x4xf32>
      %89 = arith.mulf %87, %88 : vector<32x4xf32>
      %cst_38 = arith.constant 0.000000e+00 : f32
      %90 = vector.broadcast %cst_38 : f32 to vector<32x4xf32>
      %91 = arith.select %60, %79, %90 : vector<32x4xi1>, vector<32x4xf32>
      %cst_39 = arith.constant dense<0.000000e+00> : vector<32xf32>
      %92 = vector.multi_reduction <add>, %91, %cst_39 [1] : vector<32x4xf32> to vector<32xf32>
      %93 = vector.shape_cast %92 : vector<32xf32> to vector<32x1xf32>
      %cst_40 = arith.constant 0.000000e+00 : f32
      %94 = vector.shape_cast %78 : vector<1x4xf32> to vector<1x4xf32>
      %95 = vector.broadcast %94 : vector<1x4xf32> to vector<32x4xf32>
      %96 = vector.broadcast %cst_40 : f32 to vector<32x4xf32>
      %97 = arith.select %60, %95, %96 : vector<32x4xi1>, vector<32x4xf32>
      %cst_41 = arith.constant dense<0.000000e+00> : vector<32xf32>
      %98 = vector.multi_reduction <add>, %97, %cst_41 [1] : vector<32x4xf32> to vector<32xf32>
      %99 = vector.shape_cast %98 : vector<32xf32> to vector<32x1xf32>
      %cst_42 = arith.constant 5.000000e+00 : f32
      %100 = vector.broadcast %cst_42 : f32 to vector<32x1xf32>
      %101 = arith.mulf %100, %93 : vector<32x1xf32>
      %102 = arith.subf %101, %50 : vector<32x1xf32>
      %cst_43 = arith.constant 2.500000e-01 : f32
      %103 = vector.broadcast %cst_43 : f32 to vector<32x1xf32>
      %104 = arith.mulf %102, %103 : vector<32x1xf32>
      %cst_44 = arith.constant 2.500000e+01 : f32
      %105 = vector.broadcast %cst_44 : f32 to vector<32x1xf32>
      %106 = arith.mulf %105, %99 : vector<32x1xf32>
      %cst_45 = arith.constant 1.000000e+01 : f32
      %107 = vector.broadcast %cst_45 : f32 to vector<32x1xf32>
      %108 = arith.mulf %107, %93 : vector<32x1xf32>
      %109 = arith.subf %106, %108 : vector<32x1xf32>
      %110 = arith.addf %109, %50 : vector<32x1xf32>
      %cst_46 = arith.constant 6.250000e-02 : f32
      %111 = vector.broadcast %cst_46 : f32 to vector<32x1xf32>
      %112 = arith.mulf %110, %111 : vector<32x1xf32>
      %cst_47 = arith.constant 0.000000e+00 : f32
      %113 = vector.broadcast %cst_47 : f32 to vector<32x1xf32>
      %114 = arith.maximumf %112, %113 : vector<32x1xf32>
      %115 = math.rsqrt %114 : vector<32x1xf32>
      %cst_48 = arith.constant 1.000000e+08 : f32
      %116 = vector.broadcast %cst_48 : f32 to vector<32x1xf32>
      %117 = arith.minimumf %115, %116 : vector<32x1xf32>
      %118 = arith.mulf %104, %82 : vector<32x1xf32>
      %119 = arith.mulf %118, %117 : vector<32x1xf32>
      %c0_49 = arith.constant 0 : index
      %120 = memref.load %arg3[%c0_49] : memref<2xf32, #tpu.memory_space<smem>>
      %c1 = arith.constant 1 : index
      %121 = memref.load %arg3[%c1] : memref<2xf32, #tpu.memory_space<smem>>
      %cst_50 = arith.constant 9.99999997E-7 : f32
      %122 = vector.broadcast %cst_50 : f32 to vector<32x1xf32>
      %123 = arith.addf %119, %122 : vector<32x1xf32>
      %124 = vector.broadcast %120 : f32 to vector<32x1xf32>
      %125 = arith.mulf %124, %123 : vector<32x1xf32>
      %126 = vector.broadcast %121 : f32 to vector<32x1xf32>
      %127 = arith.addf %125, %126 : vector<32x1xf32>
      %128 = vector.shape_cast %119 : vector<32x1xf32> to vector<32x1xf32>
      %129 = vector.broadcast %128 : vector<32x1xf32> to vector<32x4xf32>
      %130 = arith.select %60, %129, %89 : vector<32x4xi1>, vector<32x4xf32>
      %cst_51 = arith.constant 9.99999997E-7 : f32
      %131 = vector.broadcast %cst_51 : f32 to vector<32x4xf32>
      %132 = arith.addf %130, %131 : vector<32x4xf32>
      %133 = vector.broadcast %120 : f32 to vector<32x4xf32>
      %134 = arith.mulf %133, %132 : vector<32x4xf32>
      %135 = vector.broadcast %121 : f32 to vector<32x4xf32>
      %136 = arith.addf %134, %135 : vector<32x4xf32>
      %cst_52 = arith.constant dense<0xFF800000> : vector<32xf32>
      %137 = vector.multi_reduction <maximumf>, %136, %cst_52 [1] : vector<32x4xf32> to vector<32xf32>
      %138 = vector.shape_cast %137 : vector<32xf32> to vector<32x1xf32>
      %cst_53 = arith.constant -13.8155107 : f32
      %139 = vector.broadcast %cst_53 : f32 to vector<32x1xf32>
      %140 = arith.maximumf %138, %139 : vector<32x1xf32>
      %141 = vector.broadcast %140 : vector<32x1xf32> to vector<32x4xf32>
      %142 = arith.subf %136, %141 : vector<32x4xf32>
      %143 = math.exp %142 : vector<32x4xf32>
      %cst_54 = arith.constant dense<0.000000e+00> : vector<32xf32>
      %144 = vector.multi_reduction <add>, %143, %cst_54 [1] : vector<32x4xf32> to vector<32xf32>
      %145 = vector.shape_cast %144 : vector<32xf32> to vector<32x1xf32>
      %cst_55 = arith.constant -13.8155107 : f32
      %146 = vector.broadcast %cst_55 : f32 to vector<32x1xf32>
      %147 = arith.subf %146, %140 : vector<32x1xf32>
      %148 = math.exp %147 : vector<32x1xf32>
      %149 = arith.addf %145, %148 : vector<32x1xf32>
      %150 = math.log %149 : vector<32x1xf32>
      %151 = arith.addf %140, %150 : vector<32x1xf32>
      %152 = arith.subf %151, %127 : vector<32x1xf32>
      %153 = arith.mulf %152, %5 : vector<32x1xf32>
      %154 = vector.shape_cast %153 : vector<32x1xf32> to vector<1x32x1xf32>
      %cst_56 = arith.constant dense<0.000000e+00> : vector<1xf32>
      %155 = vector.multi_reduction <add>, %154, %cst_56 [1, 2] : vector<1x32x1xf32> to vector<1xf32>
      %156 = vector.shape_cast %155 : vector<1xf32> to vector<1x1x1xf32>
      %157 = vector.extract %156[0, 0, 0] : f32 from vector<1x1x1xf32>
      %c0_57 = arith.constant 0 : index
      %c0_58 = arith.constant 0 : index
      %158 = memref.load %arg7[%c0_57, %c0_58] : memref<1x1xf32, #tpu.memory_space<smem>>
      memref.store %157, %arg7[%c0_57, %c0_58] : memref<1x1xf32, #tpu.memory_space<smem>>
      %cst_59 = arith.constant -1.000000e+30 : f32
      %159 = vector.broadcast %cst_59 : f32 to vector<32x1xf32>
      %c0_60 = arith.constant 0 : index
      %c0_61 = arith.constant 0 : index
      %160 = vector.load %arg8[%c0_60, %c0_61] : memref<32x1xf32, #tpu.memory_space<vmem>>, vector<32x1xf32>
      tpu.vector_store %arg8[%c0_60, %c0_61], %159 {strides = array<i32>} : memref<32x1xf32, #tpu.memory_space<vmem>>, vector<32x1xf32>,
      %cst_62 = arith.constant 0.000000e+00 : f32
      %161 = vector.broadcast %cst_62 : f32 to vector<32x1xf32>
      %c0_63 = arith.constant 0 : index
      %c0_64 = arith.constant 0 : index
      %162 = vector.load %arg9[%c0_63, %c0_64] : memref<32x1xf32, #tpu.memory_space<vmem>>, vector<32x1xf32>
      tpu.vector_store %arg9[%c0_63, %c0_64], %161 {strides = array<i32>} : memref<32x1xf32, #tpu.memory_space<vmem>>, vector<32x1xf32>,
      %cst_65 = arith.constant 0.000000e+00 : f32
      %163 = vector.broadcast %cst_65 : f32 to vector<32x1xf32>
      %c0_66 = arith.constant 0 : index
      %c0_67 = arith.constant 0 : index
      %164 = vector.load %arg10[%c0_66, %c0_67] : memref<32x1xf32, #tpu.memory_space<vmem>>, vector<32x1xf32>
      tpu.vector_store %arg10[%c0_66, %c0_67], %163 {strides = array<i32>} : memref<32x1xf32, #tpu.memory_space<vmem>>, vector<32x1xf32>,
    } else {
    }
    %9 = arith.truncf %0 : vector<32x32xf32> to vector<32x32xbf16>
    %c0_2 = arith.constant 0 : index
    %c0_3 = arith.constant 0 : index
    %10 = vector.load %arg4[%c0_2, %c0_3] : memref<32x128xbf16, #tpu.memory_space<vmem>>, vector<32x128xbf16>
    %cst = arith.constant dense<0.000000e+00> : vector<32x128xf32>
    %11 = tpu.matmul %9, %10, %cst {dimension_numbers = #tpu.dot_dimension_numbers<[1], [0], [0], [1], [0, 0, 1, 1], [], []>} : vector<32x32xbf16>, vector<32x128xbf16>, vector<32x128xf32> -> vector<32x128xf32>
    %c0_4 = arith.constant 0 : index
    %c0_5 = arith.constant 0 : index
    %12 = vector.load %arg5[%c0_4, %c0_5] : memref<1x128xf32, #tpu.memory_space<vmem>>, vector<1x128xf32>
    %13 = vector.broadcast %12 : vector<1x128xf32> to vector<32x128xf32>
    %14 = arith.addf %11, %13 : vector<32x128xf32>
    %cst_6 = arith.constant dense<0xFF800000> : vector<32xf32>
    %15 = vector.multi_reduction <maximumf>, %14, %cst_6 [1] : vector<32x128xf32> to vector<32xf32>
    %16 = vector.shape_cast %15 : vector<32xf32> to vector<32x1xf32>
    %c0_7 = arith.constant 0 : index
    %c0_8 = arith.constant 0 : index
    %17 = vector.load %arg8[%c0_7, %c0_8] : memref<32x1xf32, #tpu.memory_space<vmem>>, vector<32x1xf32>
    %18 = arith.maximumf %17, %16 : vector<32x1xf32>
    %c0_9 = arith.constant 0 : index
    %c0_10 = arith.constant 0 : index
    %19 = vector.load %arg9[%c0_9, %c0_10] : memref<32x1xf32, #tpu.memory_space<vmem>>, vector<32x1xf32>
    %20 = arith.subf %17, %18 : vector<32x1xf32>
    %21 = math.exp %20 : vector<32x1xf32>
    %22 = arith.mulf %19, %21 : vector<32x1xf32>
    %23 = vector.broadcast %18 : vector<32x1xf32> to vector<32x128xf32>
    %24 = arith.subf %14, %23 : vector<32x128xf32>
    %25 = math.exp %24 : vector<32x128xf32>
    %cst_11 = arith.constant dense<0.000000e+00> : vector<32xf32>
    %26 = vector.multi_reduction <add>, %25, %cst_11 [1] : vector<32x128xf32> to vector<32xf32>
    %27 = vector.shape_cast %26 : vector<32xf32> to vector<32x1xf32>
    %28 = arith.addf %22, %27 : vector<32x1xf32>
    %c0_12 = arith.constant 0 : index
    %c0_13 = arith.constant 0 : index
    %29 = vector.load %arg9[%c0_12, %c0_13] : memref<32x1xf32, #tpu.memory_space<vmem>>, vector<32x1xf32>
    tpu.vector_store %arg9[%c0_12, %c0_13], %28 {strides = array<i32>} : memref<32x1xf32, #tpu.memory_space<vmem>>, vector<32x1xf32>,
    %c0_14 = arith.constant 0 : index
    %c0_15 = arith.constant 0 : index
    %30 = vector.load %arg8[%c0_14, %c0_15] : memref<32x1xf32, #tpu.memory_space<vmem>>, vector<32x1xf32>
    tpu.vector_store %arg8[%c0_14, %c0_15], %18 {strides = array<i32>} : memref<32x1xf32, #tpu.memory_space<vmem>>, vector<32x1xf32>,
    %31 = tpu.iota {dimensions = array<i32: 1>} : vector<32x128xi32>
    %c128_i32 = arith.constant 128 : i32
    %32 = arith.muli %arg0, %c128_i32 : i32
    %33 = vector.broadcast %32 : i32 to vector<32x128xi32>
    %34 = arith.addi %31, %33 : vector<32x128xi32>
    %c0_16 = arith.constant 0 : index
    %c0_17 = arith.constant 0 : index
    %35 = vector.load %arg2[%c0_16, %c0_17] : memref<32x1xi32, #tpu.memory_space<vmem>>, vector<32x1xi32>
    %36 = vector.broadcast %35 : vector<32x1xi32> to vector<32x128xi32>
    %37 = arith.cmpi eq, %34, %36 : vector<32x128xi32>
    %c0_18 = arith.constant 0 : index
    %c0_19 = arith.constant 0 : index
    %38 = vector.load %arg10[%c0_18, %c0_19] : memref<32x1xf32, #tpu.memory_space<vmem>>, vector<32x1xf32>
    %cst_20 = arith.constant 0.000000e+00 : f32
    %39 = vector.broadcast %cst_20 : f32 to vector<32x128xf32>
    %40 = arith.select %37, %14, %39 : vector<32x128xi1>, vector<32x128xf32>
    %cst_21 = arith.constant dense<0.000000e+00> : vector<32xf32>
    %41 = vector.multi_reduction <add>, %40, %cst_21 [1] : vector<32x128xf32> to vector<32xf32>
    %42 = vector.shape_cast %41 : vector<32xf32> to vector<32x1xf32>
    %43 = arith.addf %38, %42 : vector<32x1xf32>
    %c0_22 = arith.constant 0 : index
    %c0_23 = arith.constant 0 : index
    %44 = vector.load %arg10[%c0_22, %c0_23] : memref<32x1xf32, #tpu.memory_space<vmem>>, vector<32x1xf32>
    tpu.vector_store %arg10[%c0_22, %c0_23], %43 {strides = array<i32>} : memref<32x1xf32, #tpu.memory_space<vmem>>, vector<32x1xf32>,
    %c0_i32_24 = arith.constant 0 : i32
    %45 = arith.cmpi eq, %arg0, %c0_i32_24 : i32
    %46 = arith.extui %45 : i1 to i32
    %c0_i32_25 = arith.constant 0 : i32
    %47 = arith.cmpi ne, %46, %c0_i32_25 : i32
    scf.if %47 {
      %c0_26 = arith.constant 0 : index
      %c0_27 = arith.constant 0 : index
      %48 = vector.load %arg8[%c0_26, %c0_27] : memref<32x1xf32, #tpu.memory_space<vmem>>, vector<32x1xf32>
      %c0_28 = arith.constant 0 : index
      %c0_29 = arith.constant 0 : index
      %49 = vector.load %arg9[%c0_28, %c0_29] : memref<32x1xf32, #tpu.memory_space<vmem>>, vector<32x1xf32>
      %50 = math.log %49 : vector<32x1xf32>
      %51 = arith.addf %48, %50 : vector<32x1xf32>
      %c0_30 = arith.constant 0 : index
      %c0_31 = arith.constant 0 : index
      %52 = vector.load %arg10[%c0_30, %c0_31] : memref<32x1xf32, #tpu.memory_space<vmem>>, vector<32x1xf32>
      %53 = arith.subf %51, %52 : vector<32x1xf32>
      %54 = arith.mulf %53, %5 : vector<32x1xf32>
      %c0_32 = arith.constant 0 : index
      %c0_33 = arith.constant 0 : index
      %55 = memref.load %arg7[%c0_32, %c0_33] : memref<1x1xf32, #tpu.memory_space<smem>>
      %56 = vector.shape_cast %54 : vector<32x1xf32> to vector<1x32x1xf32>
      %cst_34 = arith.constant dense<0.000000e+00> : vector<1xf32>
      %57 = vector.multi_reduction <add>, %56, %cst_34 [1, 2] : vector<1x32x1xf32> to vector<1xf32>
      %58 = vector.shape_cast %57 : vector<1xf32> to vector<1x1x1xf32>
      %59 = vector.extract %58[0, 0, 0] : f32 from vector<1x1x1xf32>
      %cst_35 = arith.constant 5.000000e-02 : f32
      %60 = arith.mulf %59, %cst_35 : f32
      %61 = arith.addf %55, %60 : f32
      %c0_36 = arith.constant 0 : index
      %c0_37 = arith.constant 0 : index
      %62 = memref.load %arg6[%c0_36, %c0_37] : memref<1x1xf32, #tpu.memory_space<smem>>
      memref.store %61, %arg6[%c0_36, %c0_37] : memref<1x1xf32, #tpu.memory_space<smem>>
    } else {
    }
    return
  }
  func.func @transform_0(%arg0: i32) -> (i32, i32) {
    %c0_i32 = arith.constant 0 : i32
    %c0_i32_0 = arith.constant 0 : i32
    %c0_i32_1 = arith.constant 0 : i32
    return %c0_i32, %c0_i32_0 : i32, i32
  }
  func.func @transform_1(%arg0: i32) -> (i32, i32) {
    %c0_i32 = arith.constant 0 : i32
    %c0_i32_0 = arith.constant 0 : i32
    %c0_i32_1 = arith.constant 0 : i32
    return %c0_i32, %c0_i32_0 : i32, i32
  }
  func.func @transform_2(%arg0: i32) -> i32 {
    %c0_i32 = arith.constant 0 : i32
    %c0_i32_0 = arith.constant 0 : i32
    return %c0_i32 : i32
  }
  func.func @transform_3(%arg0: i32) -> (i32, i32) {
    %c0_i32 = arith.constant 0 : i32
    %c0_i32_0 = arith.constant 0 : i32
    return %c0_i32, %arg0 : i32, i32
  }
  func.func @transform_4(%arg0: i32) -> (i32, i32) {
    %c0_i32 = arith.constant 0 : i32
    %c0_i32_0 = arith.constant 0 : i32
    return %c0_i32, %arg0 : i32, i32
  }
  func.func @transform_5(%arg0: i32) -> (i32, i32) {
    %c0_i32 = arith.constant 0 : i32
    %c0_i32_0 = arith.constant 0 : i32
    %c0_i32_1 = arith.constant 0 : i32
    return %c0_i32, %c0_i32_0 : i32, i32
  }
}

</mosaic_0001>

<bundles_post_ra>
// kernel: hybrid_loss.1
= control target key start
LH: loop header
LB: loop body
LE: loop exit
PB: predicated region body
PF: predicated region fallthrough
CT: control target
= control target key end

     0   :  { %10 = vsyncpa [#allocation8], 0  ;;  %s1398_s0 = inlined_call_operand.vmem [shape: f32[32,32], index: 0, kind: input, shape index: {}]   ;;  %s1399_s1 = inlined_call_operand.vmem [shape: s32[32,1], index: 1, kind: input, shape index: {}]   ;;  %s1400_s2 = inlined_call_operand.vmem [shape: f32[2], index: 2, kind: input, shape index: {}]   ;;  %s1401_s3 = inlined_call_operand.vmem [shape: bf16[32,128], index: 3, kind: input, shape index: {}]   ;;  %s1402_s4 = inlined_call_operand.vmem [shape: f32[1,128], index: 4, kind: input, shape index: {}]   ;;  %s1403_s5 = inlined_call_operand.hbm [shape: f32[1,1], index: 5, kind: output, shape index: {}]  }
   0x1   :  { %11 = vsyncpa [#allocation7], 0  ;;  %s22_s20 = sshll.u32 %s1400_s2, 4  ;;  %s23_s20 = int_to_ptr.vmem [resolvable:$true] %s22_s20 }
   0x2   :  { %s985_s21 = scalar_lea.vmem %s23_s20, 16  ;;  %p990_p1 = scmp.lt.s32.totalorder %s23_s20, %s23_s20 }
   0x3   :  { %p986_p0 = scmp.ne.s32.totalorder %s23_s20, %s985_s21  ;;  %p991_p2 = scmp.lt.s32.totalorder %s985_s21, %s985_s21 }
   0x5   :  { %p992_p3 = por %p991_p2, %p990_p1 }
   0x7   :  { %p993_p4 = pnand %p992_p3, %p986_p0 }
   0x9   :  { %996 = shalt.err (!%p993_p4)
}
   0xa   :  { %s1011_s22 = smov [#allocation6]  }
   0xb   :  { %25 = dma.vmem_to_smem %s23_s20, 16, %s1011_s22, [#allocation8]  }
   0xc   :  { %1007 = dma.done.wait [#allocation8], 16  }
   0xd   :  { %1008 = vsyncadd [#allocation8], 4294967280 }
   0xe   :  { %33 = sfence }
   0xf   :  { %v35_v0 = vld [vmem:[%s1398_s0] sm:$0xff]  ;;  %v1057_v1 = vld [vmem:[%s1398_s0 + $0x8] sm:$0xff]  ;;  %v1062_v2 = vld [vmem:[%s1398_s0 + $0x10] sm:$0xff]  ;;  %v39_v3 = vlaneseq  ;;  %v1012_v4 = vmov 0.0|0.0   ;;  %vm1013_vm0 = vmmov 0   ;;  %v1014_v7 = vmov 0.0  }
  0x10   :  { %898 = vmatprep.subr.bf16.mxu0 %v1012_v4  ;;  %v899_v5 = vpack.c.bf16 %v1057_v1, %v35_v0  ;;  %v1068_v6 = vld [vmem:[%s1398_s0 + $0x18] sm:$0xff]  ;;  %879 = vmatprep.mubr.msk.f32.mxu0 %vm1013_vm0, %v1014_v7  ;;  %vm64_vm1 = vcmask 261120   ;;  %v60_v14 = vmul.f32 %v35_v0, %v35_v0  ;;  %v917_v19 = vld [vmem:[%s1401_s3] sm:$0xff]   ;;  %vm178_vm5 = vcmask 257024   ;;  %v918_v22 = vld [vmem:[%s1401_s3 + $0x8] sm:$0xff]   ;;  %s851_s9 = sld [smem:[#allocation6 + $0x1]] }
  0x11   :  { %v40_v8 = vshrl.u32 %v39_v3, 7  ;;  %v1071_v9 = vand.u32 127, %v39_v3  ;;  %884 = vmatprep.mubr.msk.f32.mxu1 %vm64_vm1, %v35_v0  ;;  %v902_v10 = vpack.c.bf16 %v1068_v6, %v1062_v2  ;;  %vm322_vm14 = vcmask 31744   ;;  %v852_v62 = vld [vmem:[%s1402_s4] ss:$0 sm:$0xff]  ;;  %s1244_s4 = sld [smem:[#allocation6]] }
  0x12   :  { %900 = vmatpush3.bf16.msra.mxu0 %v899_v5  ;;  %v65_v15 = vsel %vm64_vm1, %v60_v14, 0.0  ;;  %v62_v47 = vmul.f32 %v1062_v2, %v1062_v2  ;;  %v61_v50 = vmul.f32 %v1057_v1, %v1057_v1  ;;  %v63_v59 = vmul.f32 %v1068_v6, %v1068_v6  ;;  %v729_v31 = vld [vmem:[%s1399_s1] sm:$0xff]  ;;  %s997_s23 = scalar_lea.hbm %s1403_s5, 16 }
  0x13   :  { %901 = vmatprep.subr.bf16.mxu0 %v1012_v4  ;;  %v96_v11 = vmul.u32 5, %v40_v8  ;;  %66 = vadd.xlane.f32.xlu1 %v65_v15  ;;  %v79_v23 = vmul.u32 5, %v1071_v9  ;;  %v41_v24 = vadd.s32 8, %v40_v8  ;;  %v1097_v25 = vadd.s32 16, %v40_v8  ;;  %p998_p5 = scmp.ne.s32.totalorder %s1403_s5, %s997_s23  ;;  %p1001_p6 = scmp.lt.u32.totalorder %s997_s23, %s1403_s5 }
  0x14   :  { %v43_v29 = vadd.s32 24, %v40_v8  ;;  %v1101_v30 = vsub.s32 %v1071_v9, %v40_v8  ;;  %v71_v55 = vsel %vm64_vm1, %v62_v47, 0.0  ;;  %v68_v57 = vsel %vm64_vm1, %v61_v50, 0.0 }
  0x15   :  { %v97_v12 = vsub.s32 %v1071_v9, %v96_v11  ;;  %v80_v26 = vsub.s32 %v40_v8, %v79_v23  ;;  %v81_v27 = vsub.s32 %v41_v24, %v79_v23  ;;  %v82_v28 = vsub.s32 %v1097_v25, %v79_v23  ;;  %p1003_p7 = pnand %p1001_p6, %p998_p5 }
  0x16   :  { %903 = vmatpush3.bf16.msra.mxu0 %v902_v10  ;;  %v83_v32 = vsub.s32 %v43_v29, %v79_v23  ;;  %v74_v0 = vsel %vm64_vm1, %v63_v59, 0.0  ;;  %v1015_v11 = vmov -1e+30  }
  0x17   :  { %vm98_vm2 = vcmp.ge.s32.totalorder %v97_v12, 0  ;;  %vm99_vm3 = vcmp.lt.s32.totalorder %v97_v12, 5  ;;  %vm84_vm6 = vcmp.ge.s32.totalorder %v80_v26, 0  ;;  %vm88_vm7 = vcmp.lt.s32.totalorder %v80_v26, 5 }
  0x18   :  { %vm100_vm4 = vmand %vm98_vm2, %vm99_vm3  ;;  %vm85_vm8 = vcmp.ge.s32.totalorder %v81_v27, 0  ;;  %vm89_vm9 = vcmp.lt.s32.totalorder %v81_v27, 5  ;;  %vm86_vm11 = vcmp.ge.s32.totalorder %v82_v28, 0  ;;  %vm90_vm12 = vcmp.lt.s32.totalorder %v82_v28, 5 }
  0x19   :  { %v844_v13 = vsel %vm100_vm4, 1.0, %v1014_v7  ;;  %vm1103_vm10 = vmand %vm84_vm6, %vm88_vm7  ;;  %vm87_vm0 = vcmp.ge.s32.totalorder %v83_v32, 0  ;;  %vm91_vm2 = vcmp.lt.s32.totalorder %v83_v32, 5  ;;  %v1016_v12 = vmov 0  }
  0x1a   :  { %880 = vmatmul.mubr.msk.f32.vlgmr.msra.gmra.mrb[0].mxu0 %vm64_vm1, %v844_v13  ;;  %vm1109_vm13 = vmand %vm85_vm8, %vm89_vm9  ;;  %915 = vset.pattern.permute.xlu1 %v1016_v12  ;;  %vm46_vm8 = vcmp.lt.s32.totalorder %v1097_v25, 20 }
  0x1b   :  { %vm1115_vm15 = vmand %vm86_vm11, %vm90_vm12  ;;  %916 = vset.pattern.permute.xlu0 %v1016_v12 }
  0x1c   :  { %vm1127_vm3 = vmand %vm87_vm0, %vm91_vm2 }
  0xa0   :  { %v1203_v15 = vpop.xlane.xlu1 %66 }
  0xed   :  { %v172_v16 = vpop.f32.mrb[0].mxu0 }
  0xee   :  { %v176_v17 = vmul.f32 0.2, %v172_v16  ;;  %v881_v18 = vpop.f32.mrb[1].mxu0 }
  0xf0   :  { %882 = vmatprep.subr.msk.mxu1 %vm64_vm1, %v176_v17  ;;  %v177_v20 = vmul.f32 %v176_v17, %v176_v17 }
  0xf1   :  { %883 = vmatpush3.xpose.msk.msra.mxu1 %vm64_vm1, %v176_v17 }
  0xf2   :  { %v179_v21 = vsel %vm178_vm5, %v177_v20, 0.0  ;;  %890 = vmatprep.subr.bf16.mxu1 %v917_v19 }
  0xf3   :  { %180 = vadd.xlane.f32.xlu0 %v179_v21 }
  0xf4   :  { %885 = vmatmul.mubr.msk.f32.vlgmr.msra.gmra.mrb[0].mxu1 %vm64_vm1, %v1057_v1 }
  0xf5   :  { %891 = vmatpush3.bf16.msra.mxu1 %v917_v19  ;;  %887 = vmatprep.mubr.msk.f32.mxu1 %vm64_vm1, %v1062_v2 }
  0xf6   :  { %892 = vmatprep.subr.bf16.mxu1 %v918_v22 }
  0xf8   :  { %888 = vmatmul.mubr.msk.f32.gmra.mrb[2].mxu1 %vm64_vm1, %v1068_v6 }
  0xf9   :  { %893 = vmatpush3.bf16.msra.mxu1 %v918_v22  ;;  %894 = vmatprep.mubr.msk.bf16.mxu1 %vm64_vm1, %v899_v5 }
  0xfc   :  { %895 = vmatmul.mubr.msk.bf16.vlgmr.msra.gmra.mrb[4].mxu1 %vm64_vm1, %v902_v10  ;;  %vm523_vm1 = vcmask 7168  }
  0xfd   :  { %543 = vst.msk [vmem:[#allocation3 + $0x8] sm:$0xff] %vm523_vm1, %v1015_v11  ;;  %542 = vst.msk [vmem:[#allocation3] sm:$0xff] %vm523_vm1, %v1015_v11 }
  0xfe   :  { %544 = vst.msk [vmem:[#allocation3 + $0x10] sm:$0xff] %vm523_vm1, %v1015_v11  ;;  %545 = vst.msk [vmem:[#allocation3 + $0x18] sm:$0xff] %vm523_vm1, %v1015_v11 }
  0xff   :  { %546 = vst.msk [vmem:[#allocation4] sm:$0xff] %vm523_vm1, %v1014_v7  ;;  %547 = vst.msk [vmem:[#allocation4 + $0x8] sm:$0xff] %vm523_vm1, %v1014_v7 }
 0x100   :  { %548 = vst.msk [vmem:[#allocation4 + $0x10] sm:$0xff] %vm523_vm1, %v1014_v7  ;;  %549 = vst.msk [vmem:[#allocation4 + $0x18] sm:$0xff] %vm523_vm1, %v1014_v7 }
 0x101   :  { %550 = vst.msk [vmem:[#allocation5] sm:$0xff] %vm523_vm1, %v1014_v7  ;;  %551 = vst.msk [vmem:[#allocation5 + $0x8] sm:$0xff] %vm523_vm1, %v1014_v7 }
 0x102   :  { %552 = vst.msk [vmem:[#allocation5 + $0x10] sm:$0xff] %vm523_vm1, %v1014_v7  ;;  %553 = vst.msk [vmem:[#allocation5 + $0x18] sm:$0xff] %vm523_vm1, %v1014_v7 }
 0x104   :  { %v1215_v47 = vld [vmem:[#allocation3 + $0x8] sm:$0xff] }
 0x105   :  { %v1221_v59 = vld [vmem:[#allocation3 + $0x10] sm:$0xff] }
 0x180   :  { %v1107_v33 = vpop.xlane.xlu0 %180 }
 0x181   :  { %v339_v35 = vrot.slane %v1107_v33, %v1101_v30  ;;  %919 = vrsqrt.f32 %v1107_v33 }
 0x183   :  { %v347_v37 = vsel %vm1103_vm10, %v339_v35, 0.0  ;;  %v348_v38 = vsel %vm1109_vm13, %v339_v35, 0.0  ;;  %v349_v41 = vsel %vm1115_vm15, %v339_v35, 0.0  ;;  %v350_v44 = vsel %vm1127_vm3, %v339_v35, 0.0 }
 0x184   :  { %v351_v39 = vsel %vm322_vm14, %v347_v37, 0.0  ;;  %v354_v40 = vsel %vm322_vm14, %v348_v38, 0.0  ;;  %v357_v43 = vsel %vm322_vm14, %v349_v41, 0.0  ;;  %v360_v45 = vsel %vm322_vm14, %v350_v44, 0.0 }
 0x185   :  { %352 = vadd.xlane.f32.xlu0 %v351_v39  ;;  %355 = vadd.xlane.f32.xlu1 %v354_v40 }
 0x189   :  { %358 = vadd.xlane.f32.xlu0 %v357_v43 }
 0x18b   :  { %v920_v50 = vpop.eup %919 }
 0x18d   :  { %361 = vadd.xlane.f32.xlu0 %v360_v45 }
 0x1c7   :  { %v1135_v46 = vpop.f32.mrb[0].mxu1 }
 0x1c8   :  { %v1139_v48 = vpop.f32.mrb[1].mxu1  ;;  %v319_v49 = vsel %vm1109_vm13, %v1135_v46, 0.0 }
 0x1c9   :  { %v326_v51 = vsel %vm322_vm14, %v319_v49, 0.0  ;;  %v318_v52 = vsel %vm1103_vm10, %v1139_v48, 0.0 }
 0x1ca   :  { %327 = vadd.xlane.f32.xlu1 %v326_v51  ;;  %v323_v53 = vsel %vm322_vm14, %v318_v52, 0.0 }
 0x1cb   :  { %324 = vadd.xlane.f32.xlu0 %v323_v53  ;;  %v1151_v54 = vpop.f32.mrb[2].mxu1 }
 0x1cc   :  { %v1154_v56 = vpop.f32.mrb[3].mxu1  ;;  %v321_v58 = vsel %vm1127_vm3, %v1151_v54, 0.0 }
 0x1cd   :  { %v332_v61 = vsel %vm322_vm14, %v321_v58, 0.0  ;;  %v320_v3 = vsel %vm1115_vm15, %v1154_v56, 0.0 }
 0x1ce   :  { %72 = vadd.xlane.f32.xlu1 %v71_v55  ;;  %v329_v5 = vsel %vm322_vm14, %v320_v3, 0.0  ;;  %v291_v3 = vmin.f32 %v920_v50, 1e+08 }
 0x1cf   :  { %69 = vadd.xlane.f32.xlu0 %v68_v57  ;;  %v896_v60 = vpop.f32.mrb[4].mxu1 }
 0x1d0   :  { %v620_v63 = vpop.f32.mrb[5].mxu1  ;;  %v1173_v6 = vadd.f32 %v896_v60, %v852_v62 }
 0x1d1   :  { %v897_v1 = vpop.f32.mrb[6].mxu1  ;;  %v1180_v10 = vadd.f32 %v852_v62, %v620_v63 }
 0x1d2   :  { %333 = vadd.xlane.f32.xlu1 %v332_v61  ;;  %v623_v2 = vpop.f32.mrb[7].mxu1  ;;  %v1175_v8 = vadd.f32 %v897_v1, %v852_v62  ;;  %v1224_v1 = vld [vmem:[#allocation3 + $0x18] sm:$0xff] }
 0x1d3   :  { %75 = vadd.xlane.f32.xlu0 %v74_v0  ;;  %v1170_v4 = vadd.f32 %v852_v62, %v623_v2 }
 0x1d6   :  { %330 = vadd.xlane.f32.xlu1 %v329_v5 }
 0x1d7   :  { %637 = vmax.xlane.f32.xlu0 %v1170_v4 }
 0x1da   :  { %639 = vmax.xlane.f32.xlu1 %v1173_v6 }
 0x1db   :  { %641 = vmax.xlane.f32.xlu0 %v1175_v8 }
 0x1de   :  { %635 = vmax.xlane.f32.xlu1 %v1180_v10 }
 0x212   :  { %v353_v13 = vpop.xlane.xlu0 %352  ;;  %v356_v16 = vpop.xlane.xlu1 %355 }
 0x213   :  { %v376_v19 = vmul.f32 25.0, %v356_v16  ;;  %v375_v22 = vmul.f32 25.0, %v353_v13 }
 0x216   :  { %v359_v14 = vpop.xlane.xlu0 %358 }
 0x217   :  { %v377_v55 = vmul.f32 25.0, %v359_v14 }
 0x21a   :  { %v362_v17 = vpop.xlane.xlu0 %361 }
 0x21b   :  { %v378_v38 = vmul.f32 25.0, %v362_v17 }
 0x257   :  { %v328_v18 = vpop.xlane.xlu1 %327 }
 0x258   :  { %v380_v20 = vmul.f32 10.0, %v328_v18  ;;  %v325_v21 = vpop.xlane.xlu0 %324  ;;  %v364_v61 = vmul.f32 5.0, %v328_v18 }
 0x259   :  { %v379_v23 = vmul.f32 10.0, %v325_v21  ;;  %v363_v43 = vmul.f32 5.0, %v325_v21 }
 0x25a   :  { %v384_v24 = vsub.f32 %v376_v19, %v380_v20 }
 0x25b   :  { %v383_v26 = vsub.f32 %v375_v22, %v379_v23  ;;  %v73_v27 = vpop.xlane.xlu1 %72  ;;  %v367_v62 = vsub.f32 %v363_v43, %v1203_v15  ;;  %v300_v43 = vrot.slane %v291_v3, %v1101_v30 }
 0x25c   :  { %921 = vrsqrt.f32 %v73_v27  ;;  %v1206_v28 = vpop.xlane.xlu0 %69 }
 0x25d   :  { %v387_v29 = vadd.f32 %v383_v26, %v1203_v15  ;;  %923 = vrsqrt.f32 %v1206_v28  ;;  %v388_v32 = vadd.f32 %v384_v24, %v1206_v28  ;;  %v368_v14 = vsub.f32 %v364_v61, %v1206_v28  ;;  %v1242_v24 = vld [vmem:[#allocation3] sm:$0xff] }
 0x25e   :  { %925 = vrsqrt.f32 %v1203_v15  ;;  %v371_v26 = vmul.f32 0.25, %v367_v62  ;;  %v421_v62 = vstv %s1244_s4 }
 0x25f   :  { %v391_v35 = vmul.f32 0.0625, %v387_v29  ;;  %v334_v37 = vpop.xlane.xlu1 %333  ;;  %v392_v39 = vmul.f32 0.0625, %v388_v32 }
 0x260   :  { %v382_v40 = vmul.f32 10.0, %v334_v37  ;;  %v1212_v33 = vpop.xlane.xlu0 %75  ;;  %v366_v28 = vmul.f32 5.0, %v334_v37 }
 0x261   :  { %v395_v41 = vmax.f32 %v391_v35, 0.0  ;;  %v396_v44 = vmax.f32 %v392_v39, 0.0  ;;  %927 = vrsqrt.f32 %v1212_v33  ;;  %v372_v39 = vmul.f32 0.25, %v368_v14 }
 0x262   :  { %v386_v45 = vsub.f32 %v378_v38, %v382_v40 }
 0x263   :  { %929 = vrsqrt.f32 %v395_v41  ;;  %v331_v49 = vpop.xlane.xlu1 %330 }
 0x264   :  { %931 = vrsqrt.f32 %v396_v44  ;;  %v390_v51 = vadd.f32 %v386_v45, %v1212_v33  ;;  %v365_v52 = vmul.f32 5.0, %v331_v49  ;;  %v638_v53 = vpop.xlane.xlu0 %637  ;;  %v381_v57 = vmul.f32 10.0, %v331_v49 }
 0x265   :  { %v1219_v58 = vmax.f32 %v1215_v47, %v638_v53  ;;  %v370_v53 = vsub.f32 %v366_v28, %v1212_v33 }
 0x266   :  { %v922_v60 = vpop.eup %921  ;;  %v394_v63 = vmul.f32 0.0625, %v390_v51  ;;  %v369_v0 = vsub.f32 %v365_v52, %v73_v27  ;;  %v385_v11 = vsub.f32 %v377_v55, %v381_v57 }
 0x267   :  { %v924_v2 = vpop.eup %923  ;;  %v288_v5 = vmin.f32 %v922_v60, 1e+08  ;;  %v656_v12 = vsub.f32 %v1215_v47, %v1219_v58  ;;  %721 = vst.msk [vmem:[#allocation3 + $0x8] sm:$0xff] %vm523_vm1, %v1219_v58  ;;  %v640_v13 = vpop.xlane.xlu1 %639  ;;  %v374_v3 = vmul.f32 0.25, %v370_v53 }
 0x268   :  { %v398_v16 = vmax.f32 %v394_v63, 0.0  ;;  %v373_v17 = vmul.f32 0.25, %v369_v0  ;;  %v1232_v15 = vmax.f32 %v1221_v59, %v640_v13  ;;  %v642_v18 = vpop.xlane.xlu0 %641  ;;  %v1234_v19 = vpop.eup %925  ;;  %v287_v21 = vmin.f32 %v924_v2, 1e+08 }
 0x269   :  { %v1237_v20 = vmul.f32 %v288_v5, %v1154_v56  ;;  %v389_v22 = vadd.f32 %v385_v11, %v73_v27  ;;  %v1240_v23 = vmax.f32 %v1224_v1, %v642_v18  ;;  %v286_v38 = vmin.f32 %v1234_v19, 1e+08 }
 0x26a   :  { %933 = vrsqrt.f32 %v398_v16  ;;  %v409_v29 = vmul.f32 %v373_v17, %v288_v5  ;;  %722 = vst.msk [vmem:[#allocation3 + $0x10] sm:$0xff] %vm523_vm1, %v1232_v15  ;;  %v657_v56 = vsub.f32 %v1221_v59, %v1232_v15  ;;  %v293_v44 = vmul.f32 %v1135_v46, %v287_v21 }
 0x26b   :  { %v393_v32 = vmul.f32 0.0625, %v389_v22  ;;  %723 = vst.msk [vmem:[#allocation3 + $0x18] sm:$0xff] %vm523_vm1, %v1240_v23  ;;  %v636_v27 = vpop.xlane.xlu1 %635  ;;  %v928_v35 = vpop.eup %927  ;;  %v658_v37 = vsub.f32 %v1224_v1, %v1240_v23  ;;  %v407_v51 = vmul.f32 %v371_v26, %v286_v38  ;;  %v408_v52 = vmul.f32 %v372_v39, %v287_v21 }
 0x26c   :  { %v1256_v40 = vmax.f32 %v1242_v24, %v636_v27  ;;  %v289_v57 = vmin.f32 %v928_v35, 1e+08  ;;  %v315_v60 = vmul.f32 %v300_v43, %v293_v44  ;;  %v426_v0 = vstv %s851_s9 }
 0x26d   :  { %v930_v41 = vpop.eup %929  ;;  %v397_v45 = vmax.f32 %v393_v32, 0.0 }
 0x26e   :  { %v932_v49 = vpop.eup %931  ;;  %v403_v50 = vmin.f32 %v930_v41, 1e+08  ;;  %720 = vst.msk [vmem:[#allocation3] sm:$0xff] %vm523_vm1, %v1256_v40  ;;  %673 = vperm.xlu1 %915, %v1256_v40   ;;  %v655_v30 = vsub.f32 %v1242_v24, %v1256_v40  ;;  %v295_v33 = vmul.f32 %v1151_v54, %v289_v57  ;;  %v410_v17 = vmul.f32 %v374_v3, %v289_v57 }
 0x26f   :  { %v404_v55 = vmin.f32 %v932_v49, 1e+08  ;;  %935 = vrsqrt.f32 %v397_v45  ;;  %v292_v45 = vmul.f32 %v286_v38, %v1139_v48  ;;  %v316_v49 = vmul.f32 %v300_v43, %v1237_v20 }
 0x270   :  { %v411_v46 = vmul.f32 %v407_v51, %v403_v50  ;;  %v317_v22 = vmul.f32 %v300_v43, %v295_v33 }
 0x271   :  { %v412_v61 = vmul.f32 %v408_v52, %v404_v55 }
 0x272   :  { %v417_v63 = vadd.f32 1e-06, %v411_v46 }
 0x273   :  { %v418_v2 = vadd.f32 1e-06, %v412_v61  ;;  %v432_v5 = vsel %vm1109_vm13, %v412_v61, %v315_v60  ;;  %v314_v60 = vmul.f32 %v300_v43, %v292_v45  ;;  %v730_v43 = vld [vmem:[%s1399_s1 + $0x8] sm:$0xff] }
 0x274   :  { %v934_v11 = vpop.eup %933  ;;  %v436_v13 = vadd.f32 1e-06, %v432_v5  ;;  %v422_v14 = vmul.f32 %v421_v62, %v417_v63 }
 0x275   :  { %v406_v16 = vmin.f32 %v934_v11, 1e+08  ;;  %v423_v18 = vmul.f32 %v421_v62, %v418_v2  ;;  %v431_v48 = vsel %vm1103_vm10, %v411_v46, %v314_v60  ;;  %v731_v46 = vld [vmem:[%s1399_s1 + $0x10] sm:$0xff] }
 0x276   :  { %v440_v19 = vmul.f32 %v436_v13, %v421_v62  ;;  %v1270_v21 = vadd.f32 %v426_v0, %v422_v14  ;;  %v435_v38 = vadd.f32 1e-06, %v431_v48 }
 0x277   :  { %v414_v26 = vmul.f32 %v410_v17, %v406_v16  ;;  %v1272_v28 = vadd.f32 %v426_v0, %v423_v18 }
 0x278   :  { %v1274_v32 = vadd.f32 %v440_v19, %v426_v0  ;;  %v439_v33 = vmul.f32 %v435_v38, %v421_v62 }
 0x279   :  { %v936_v54 = vpop.eup %935  ;;  %v420_v27 = vadd.f32 1e-06, %v414_v26  ;;  %v434_v34 = vsel %vm1127_vm3, %v414_v26, %v317_v22 }
 0x27a   :  { %v405_v35 = vmin.f32 %v936_v54, 1e+08  ;;  %v450_v39 = vsel %vm322_vm14, %v1274_v32, -inf  ;;  %v438_v41 = vadd.f32 1e-06, %v434_v34  ;;  %v443_v3 = vadd.f32 %v439_v33, %v426_v0 }
 0x27b   :  { %451 = vmax.xlane.f32.xlu0 %v450_v39  ;;  %v425_v44 = vmul.f32 %v421_v62, %v420_v27 }
 0x27c   :  { %v413_v50 = vmul.f32 %v409_v29, %v405_v35  ;;  %v442_v51 = vmul.f32 %v438_v41, %v421_v62  ;;  %v447_v36 = vsel %vm322_vm14, %v443_v3, -inf }
 0x27d   :  { %v1282_v52 = vadd.f32 %v426_v0, %v425_v44 }
 0x27e   :  { %v419_v53 = vadd.f32 1e-06, %v413_v50  ;;  %v446_v55 = vadd.f32 %v442_v51, %v426_v0  ;;  %v433_v42 = vsel %vm1115_vm15, %v413_v50, %v316_v49 }
 0x27f   :  { %v437_v57 = vadd.f32 1e-06, %v433_v42 }
 0x280   :  { %v456_v61 = vsel %vm322_vm14, %v446_v55, -inf  ;;  %v424_v63 = vmul.f32 %v421_v62, %v419_v53 }
 0x281   :  { %457 = vmax.xlane.f32.xlu0 %v456_v61  ;;  %v441_v2 = vmul.f32 %v437_v57, %v421_v62 }
 0x282   :  { %v1289_v20 = vadd.f32 %v426_v0, %v424_v63 }
 0x283   :  { %v1291_v29 = vadd.f32 %v441_v2, %v426_v0  ;;  %v732_v0 = vld [vmem:[%s1399_s1 + $0x18] sm:$0xff] }
 0x285   :  { %v453_v62 = vsel %vm322_vm14, %v1291_v29, -inf }
 0x292   :  { %448 = vmax.xlane.f32.xlu1 %v447_v36 }
 0x297   :  { %678 = vperm.xlu0 %916, %v1219_v58  }
 0x2a3   :  { %683 = vperm.xlu1 %915, %v1232_v15  }
 0x2a7   :  { %688 = vperm.xlu1 %915, %v1240_v23   ;;  %v653_v23 = vld [vmem:[#allocation4 + $0x10] sm:$0xff] }
 0x2ab   :  { %734 = vperm.xlu1 %915, %v729_v31  }
 0x2af   :  { %737 = vperm.xlu1 %915, %v730_v43  }
 0x2b3   :  { %740 = vperm.xlu1 %915, %v731_v46  }
 0x2d7   :  { %454 = vmax.xlane.f32.xlu1 %v453_v62 }
 0x2e8   :  { %743 = vperm.xlu1 %915, %v732_v0  }
 0x2ed   :  { %v674_v17 = vpop.permute.xlu1 %673 }
 0x2ee   :  { %v691_v26 = vsub.f32 %v1180_v10, %v674_v17 }
 0x2f0   :  { %v695_v44 = vmul.f32 1.442695, %v691_v26 }
 0x308   :  { %v452_v5 = vpop.xlane.xlu0 %451 }
 0x309   :  { %v1312_v18 = vmax.f32 %v452_v5, -13.815511 }
 0x30b   :  { %v464_v54 = vsub.f32 %v1274_v32, %v1312_v18  ;;  %v488_v58 = vsub.f32 -13.815511, %v1312_v18 }
 0x30d   :  { %v469_v49 = vmul.f32 1.442695, %v464_v54  ;;  %v652_v54 = vld [vmem:[#allocation4 + $0x8] sm:$0xff] }
 0x30e   :  { %v458_v11 = vpop.xlane.xlu0 %457 }
 0x30f   :  { %v1320_v39 = vmax.f32 %v458_v11, -13.815511 }
 0x311   :  { %v466_v53 = vsub.f32 %v446_v55, %v1320_v39 }
 0x313   :  { %v473_v57 = vmul.f32 1.442695, %v466_v53 }
 0x316   :  { %v679_v13 = vpop.permute.xlu0 %678 }
 0x317   :  { %v692_v14 = vsub.f32 %v1170_v4, %v679_v13 }
 0x319   :  { %v697_v16 = vmul.f32 1.442695, %v692_v14 }
 0x31b   :  { %937 = vpow2.f32 %v697_v16 }
 0x31f   :  { %v449_v19 = vpop.xlane.xlu1 %448 }
 0x320   :  { %v1314_v22 = vmax.f32 %v449_v19, -13.815511  ;;  %v663_v19 = vmul.f32 1.442695, %v657_v56 }
 0x322   :  { %v463_v41 = vsub.f32 %v443_v3, %v1314_v22  ;;  %v487_v59 = vsub.f32 -13.815511, %v1314_v22 }
 0x323   :  { %v684_v27 = vpop.permute.xlu1 %683 }
 0x324   :  { %v693_v34 = vsub.f32 %v1173_v6, %v684_v27  ;;  %v467_v42 = vmul.f32 1.442695, %v463_v41  ;;  %v491_v15 = vmul.f32 1.442695, %v487_v59 }
 0x325   :  { %v938_v35 = vpop.eup %937 }
 0x326   :  { %v699_v45 = vmul.f32 1.442695, %v693_v34  ;;  %705 = vadd.xlane.f32.xlu0 %v938_v35  ;;  %v651_v34 = vld [vmem:[#allocation4] sm:$0xff] }
 0x327   :  { %v689_v50 = vpop.permute.xlu1 %688 }
 0x328   :  { %939 = vpow2.f32 %v699_v45  ;;  %v694_v51 = vsub.f32 %v1175_v8, %v689_v50 }
 0x329   :  { %941 = vpow2.f32 %v695_v44 }
 0x32a   :  { %v701_v32 = vmul.f32 1.442695, %v694_v51  ;;  %943 = vpow2.f32 %v469_v49 }
 0x32b   :  { %v735_v48 = vpop.permute.xlu1 %734 }
 0x32c   :  { %945 = vpow2.f32 %v701_v32  ;;  %vm745_vm6 = vcmp.eq.s32.totalorder %v1071_v9, %v735_v48 }
 0x32d   :  { %947 = vpow2.f32 %v467_v42 }
 0x32e   :  { %949 = vpow2.f32 %v473_v57 }
 0x32f   :  { %v738_v36 = vpop.permute.xlu1 %737 }
 0x330   :  { %vm746_vm4 = vcmp.eq.s32.totalorder %v1071_v9, %v738_v36 }
 0x331   :  { %v754_v43 = vsel %vm746_vm4, %v1170_v4, 0.0  ;;  %v753_v4 = vsel %vm745_vm6, %v1180_v10, 0.0  ;;  %v665_v10 = vmul.f32 1.442695, %v658_v37 }
 0x332   :  { %v940_v60 = vpop.eup %939 }
 0x333   :  { %707 = vadd.xlane.f32.xlu1 %v940_v60  ;;  %v942_v61 = vpop.eup %941  ;;  %v741_v46 = vpop.permute.xlu1 %740 }
 0x334   :  { %v944_v63 = vpop.eup %943  ;;  %vm747_vm7 = vcmp.eq.s32.totalorder %v1071_v9, %v741_v46 }
 0x335   :  { %v478_v55 = vsel %vm322_vm14, %v944_v63, 0.0 }
 0x336   :  { %v946_v2 = vpop.eup %945 }
 0x337   :  { %v948_v38 = vpop.eup %947  ;;  %703 = vadd.xlane.f32.xlu1 %v942_v61  ;;  %709 = vadd.xlane.f32.xlu0 %v946_v2  ;;  %v750_v2 = vld [vmem:[#allocation5 + $0x8] sm:$0xff] }
 0x338   :  { %v475_v33 = vsel %vm322_vm14, %v948_v38, 0.0  ;;  %v950_v3 = vpop.eup %949 }
 0x339   :  { %v484_v31 = vsel %vm322_vm14, %v950_v3, 0.0 }
 0x33b   :  { %476 = vadd.xlane.f32.xlu1 %v475_v33  ;;  %479 = vadd.xlane.f32.xlu0 %v478_v55 }
 0x33f   :  { %485 = vadd.xlane.f32.xlu0 %v484_v31 }
 0x343   :  { %759 = vadd.xlane.f32.xlu0 %v754_v43 }
 0x364   :  { %v455_v62 = vpop.xlane.xlu1 %454 }
 0x365   :  { %v1330_v0 = vmax.f32 %v455_v62, -13.815511 }
 0x367   :  { %v465_v5 = vsub.f32 %v1291_v29, %v1330_v0  ;;  %v755_v29 = vsel %vm747_vm7, %v1173_v6, 0.0 }
 0x368   :  { %v744_v11 = vpop.permute.xlu1 %743 }
 0x369   :  { %v471_v13 = vmul.f32 1.442695, %v465_v5  ;;  %vm748_vm5 = vcmp.eq.s32.totalorder %v1071_v9, %v744_v11  ;;  %v659_v9 = vmul.f32 1.442695, %v655_v30  ;;  %v654_v30 = vld [vmem:[#allocation4 + $0x18] sm:$0xff] }
 0x36a   :  { %v756_v14 = vsel %vm748_vm5, %v1175_v8, 0.0  ;;  %v661_v8 = vmul.f32 1.442695, %v656_v12  ;;  %v493_v12 = vmul.f32 1.442695, %v488_v58 }
 0x36b   :  { %951 = vpow2.f32 %v471_v13  ;;  %763 = vadd.xlane.f32.xlu0 %v756_v14  ;;  %v490_v14 = vsub.f32 -13.815511, %v1320_v39 }
 0x36c   :  { %953 = vpow2.f32 %v661_v8 }
 0x36d   :  { %955 = vpow2.f32 %v663_v19 }
 0x36e   :  { %957 = vpow2.f32 %v665_v10 }
 0x36f   :  { %959 = vpow2.f32 %v659_v9 }
 0x370   :  { %961 = vpow2.f32 %v493_v12 }
 0x371   :  { %963 = vpow2.f32 %v491_v15  ;;  %v751_v15 = vld [vmem:[#allocation5 + $0x10] sm:$0xff] }
 0x375   :  { %v952_v16 = vpop.eup %951 }
 0x376   :  { %v481_v17 = vsel %vm322_vm14, %v952_v16, 0.0  ;;  %v954_v26 = vpop.eup %953  ;;  %v497_v16 = vmul.f32 1.442695, %v490_v14 }
 0x377   :  { %482 = vadd.xlane.f32.xlu1 %v481_v17  ;;  %v668_v6 = vmul.f32 %v954_v26, %v652_v54  ;;  %v956_v1 = vpop.eup %955  ;;  %v489_v17 = vsub.f32 -13.815511, %v1330_v0 }
 0x378   :  { %v958_v56 = vpop.eup %957  ;;  %v669_v24 = vmul.f32 %v956_v1, %v653_v23 }
 0x379   :  { %v960_v37 = vpop.eup %959  ;;  %v670_v41 = vmul.f32 %v958_v56, %v654_v30 }
 0x37a   :  { %v667_v44 = vmul.f32 %v960_v37, %v651_v34  ;;  %v962_v53 = vpop.eup %961 }
 0x37b   :  { %757 = vadd.xlane.f32.xlu1 %v753_v4  ;;  %v964_v42 = vpop.eup %963  ;;  %v495_v4 = vmul.f32 1.442695, %v489_v17 }
 0x37f   :  { %761 = vadd.xlane.f32.xlu1 %v755_v29 }
 0x3b3   :  { %v706_v27 = vpop.xlane.xlu0 %705 }
 0x3b4   :  { %v712_v47 = vadd.f32 %v706_v27, %v668_v6  ;;  %v749_v27 = vld [vmem:[#allocation5] sm:$0xff] }
 0x3b6   :  { %717 = vst.msk [vmem:[#allocation4 + $0x8] sm:$0xff] %vm523_vm1, %v712_v47 }
 0x3bd   :  { %v781_v19 = vld [vmem:[#allocation4 + $0x8] sm:$0xff] }
 0x3c0   :  { %v708_v40 = vpop.xlane.xlu1 %707 }
 0x3c1   :  { %v713_v35 = vadd.f32 %v708_v40, %v669_v24 }
 0x3c3   :  { %718 = vst.msk [vmem:[#allocation4 + $0x10] sm:$0xff] %vm523_vm1, %v713_v35 }
 0x3c4   :  { %v710_v45 = vpop.xlane.xlu0 %709  ;;  %v704_v49 = vpop.xlane.xlu1 %703 }
 0x3c5   :  { %v714_v50 = vadd.f32 %v710_v45, %v670_v41  ;;  %v711_v51 = vadd.f32 %v704_v49, %v667_v44  ;;  %v776_v44 = vld [vmem:[#allocation3] sm:$0xff]  ;;  %v777_v49 = vld [vmem:[#allocation3 + $0x8] sm:$0xff] }
 0x3c7   :  { %719 = vst.msk [vmem:[#allocation4 + $0x18] sm:$0xff] %vm523_vm1, %v714_v50  ;;  %716 = vst.msk [vmem:[#allocation4] sm:$0xff] %vm523_vm1, %v711_v51  ;;  %v779_v50 = vld [vmem:[#allocation3 + $0x18] sm:$0xff] }
 0x3c8   :  { %v480_v32 = vpop.xlane.xlu0 %479  ;;  %v477_v57 = vpop.xlane.xlu1 %476 }
 0x3c9   :  { %v500_v60 = vadd.f32 %v962_v53, %v480_v32  ;;  %v499_v61 = vadd.f32 %v964_v42, %v477_v57 }
 0x3ca   :  { %v782_v54 = vld [vmem:[#allocation4 + $0x10] sm:$0xff] }
 0x3cb   :  { %965 = vlog2.f32 %v500_v60 }
 0x3cc   :  { %967 = vlog2.f32 %v499_v61  ;;  %v486_v63 = vpop.xlane.xlu0 %485 }
 0x3cd   :  { %969 = vpow2.f32 %v497_v16 }
 0x3ce   :  { %971 = vpow2.f32 %v495_v4  ;;  %v783_v26 = vld [vmem:[#allocation4 + $0x18] sm:$0xff] }
 0x3d0   :  { %v760_v48 = vpop.xlane.xlu0 %759 }
 0x3d1   :  { %v766_v38 = vadd.f32 %v760_v48, %v750_v2 }
 0x3d3   :  { %770 = vst.msk [vmem:[#allocation5 + $0x8] sm:$0xff] %vm523_vm1, %v766_v38 }
 0x3d5   :  { %v966_v33 = vpop.eup %965 }
 0x3d6   :  { %v968_v55 = vpop.eup %967  ;;  %v506_v3 = vmul.f32 0.6931472, %v966_v33  ;;  %v843_v33 = vsel %vm46_vm8, 1.0, %v1014_v7 }
 0x3d7   :  { %v504_v36 = vmul.f32 0.6931472, %v968_v55  ;;  %v970_v8 = vpop.eup %969 }
 0x3d8   :  { %v512_v31 = vadd.f32 %v506_v3, %v1312_v18  ;;  %v752_v18 = vld [vmem:[#allocation5 + $0x18] sm:$0xff]  ;;  %v972_v10 = vpop.eup %971 }
 0x3d9   :  { %v511_v43 = vadd.f32 %v504_v36, %v1314_v22 }
 0x3da   :  { %v516_v46 = vsub.f32 %v512_v31, %v1272_v28  ;;  %v502_v28 = vadd.f32 %v970_v8, %v486_v63  ;;  %v797_v57 = vld [vmem:[#allocation5 + $0x8] sm:$0xff] }
 0x3db   :  { %v515_v62 = vsub.f32 %v511_v43, %v1270_v21  ;;  %v780_v21 = vld [vmem:[#allocation4] sm:$0xff] }
 0x3dc   :  { %v525_v5 = vsel %vm523_vm1, %v516_v46, 0.0  ;;  %973 = vlog2.f32 %v502_v28 }
 0x3dd   :  { %v524_v11 = vsel %vm523_vm1, %v515_v62, 0.0  ;;  %975 = vlog2.f32 %v780_v21 }
 0x3de   :  { %v1366_v13 = vadd.f32 %v525_v5, %v524_v11  ;;  %977 = vlog2.f32 %v781_v19 }
 0x3df   :  { %979 = vlog2.f32 %v783_v26 }
 0x3e0   :  { %981 = vlog2.f32 %v782_v54 }
 0x3e6   :  { %v974_v58 = vpop.eup %973 }
 0x3e7   :  { %v976_v12 = vpop.eup %975  ;;  %v510_v56 = vmul.f32 0.6931472, %v974_v58 }
 0x3e8   :  { %v978_v1 = vpop.eup %977  ;;  %v785_v40 = vmul.f32 0.6931472, %v976_v12 }
 0x3e9   :  { %v980_v23 = vpop.eup %979  ;;  %v787_v34 = vmul.f32 0.6931472, %v978_v1  ;;  %v514_v41 = vadd.f32 %v510_v56, %v1320_v39  ;;  %v778_v39 = vld [vmem:[#allocation3 + $0x10] sm:$0xff] }
 0x3ea   :  { %v982_v30 = vpop.eup %981  ;;  %v791_v35 = vmul.f32 0.6931472, %v980_v23  ;;  %v792_v53 = vadd.f32 %v785_v40, %v776_v44 }
 0x3eb   :  { %v789_v51 = vmul.f32 0.6931472, %v982_v30  ;;  %v793_v61 = vadd.f32 %v787_v34, %v777_v49  ;;  %v518_v38 = vsub.f32 %v514_v41, %v1282_v52 }
 0x3ec   :  { %v795_v63 = vadd.f32 %v791_v35, %v779_v50 }
 0x3ed   :  { %v794_v55 = vadd.f32 %v789_v51, %v778_v39  ;;  %v801_v3 = vsub.f32 %v793_v61, %v797_v57  ;;  %v522_v5 = vmul.f32 0.0, %v518_v38 }
 0x3ef   :  { %v529_v4 = vsel %vm523_vm1, %v522_v5, 0.0 }
 0x3f8   :  { %v764_v29 = vpop.xlane.xlu0 %763 }
 0x3f9   :  { %v768_v22 = vadd.f32 %v764_v29, %v752_v18 }
 0x3fb   :  { %772 = vst.msk [vmem:[#allocation5 + $0x18] sm:$0xff] %vm523_vm1, %v768_v22 }
 0x402   :  { %v799_v60 = vld [vmem:[#allocation5 + $0x18] sm:$0xff] }
 0x403   :  { %v803_v36 = vsub.f32 %v795_v63, %v799_v60 }
 0x404   :  { %v483_v9 = vpop.xlane.xlu1 %482 }
 0x405   :  { %v501_v6 = vadd.f32 %v972_v10, %v483_v9  ;;  %v807_v14 = vmul.f32 0.0, %v803_v36 }
 0x407   :  { %983 = vlog2.f32 %v501_v6  ;;  %v814_v29 = vsel %vm523_vm1, %v807_v14, 0.0 }
 0x408   :  { %v758_v47 = vpop.xlane.xlu1 %757 }
 0x409   :  { %v765_v59 = vadd.f32 %v758_v47, %v749_v27 }
 0x40b   :  { %769 = vst.msk [vmem:[#allocation5] sm:$0xff] %vm523_vm1, %v765_v59 }
 0x40c   :  { %v762_v24 = vpop.xlane.xlu1 %761 }
 0x40d   :  { %v767_v37 = vadd.f32 %v762_v24, %v751_v15 }
 0x40f   :  { %771 = vst.msk [vmem:[#allocation5 + $0x10] sm:$0xff] %vm523_vm1, %v767_v37 }
 0x411   :  { %v984_v45 = vpop.eup %983 }
 0x412   :  { %v508_v42 = vmul.f32 0.6931472, %v984_v45  ;;  %v796_v32 = vld [vmem:[#allocation5] sm:$0xff] }
 0x413   :  { %v800_v2 = vsub.f32 %v792_v53, %v796_v32 }
 0x414   :  { %v513_v48 = vadd.f32 %v508_v42, %v1330_v0  ;;  %v810_v0 = vsel %vm523_vm1, %v801_v3, 0.0 }
 0x415   :  { %v809_v46 = vsel %vm523_vm1, %v800_v2, 0.0 }
 0x416   :  { %v517_v31 = vsub.f32 %v513_v48, %v1289_v20  ;;  %v798_v43 = vld [vmem:[#allocation5 + $0x10] sm:$0xff]  ;;  %v811_v16 = vadd.f32 %v810_v0, %v809_v46 }
 0x417   :  { %v802_v25 = vsub.f32 %v794_v55, %v798_v43 }
 0x418   :  { %v521_v62 = vmul.f32 %v843_v33, %v517_v31 }
 0x419   :  { %v806_v11 = vmul.f32 %v843_v33, %v802_v25 }
 0x41a   :  { %v527_v52 = vsel %vm523_vm1, %v521_v62, 0.0 }
 0x41b   :  { %v528_v7 = vadd.f32 %v527_v52, %v1366_v13  ;;  %v812_v17 = vsel %vm523_vm1, %v806_v11, 0.0 }
 0x41c   :  { %v813_v20 = vadd.f32 %v812_v17, %v811_v16 }
 0x41d   :  { %v530_v18 = vadd.f32 %v529_v4, %v528_v7 }
 0x41e   :  { %v815_v22 = vadd.f32 %v814_v29, %v813_v20 }
 0x41f   :  { %531 = vadd.xlane.f32.xlu1 %v530_v18 }
 0x420   :  { %816 = vadd.xlane.f32.xlu0 %v815_v22 }
 0x4ac   :  { %v532_v8 = vpop.xlane.xlu1 %531 }
 0x4ad   :  { %v533_v28 = vrot.slane %v532_v8, 4  ;;  %v817_v21 = vpop.xlane.xlu0 %816 }
 0x4ae   :  { %v818_v19 = vrot.slane %v817_v21, 4 }
 0x4af   :  { %v534_v26 = vadd.f32 %v533_v28, %v532_v8 }
 0x4b0   :  { %v819_v54 = vadd.f32 %v818_v19, %v817_v21 }
 0x4b1   :  { %v535_v10 = vrot.slane %v534_v26, 2 }
 0x4b2   :  { %v820_v9 = vrot.slane %v819_v54, 2 }
 0x4b3   :  { %v536_v13 = vadd.f32 %v535_v10, %v534_v26 }
 0x4b4   :  { %v821_v6 = vadd.f32 %v820_v9, %v819_v54 }
 0x4b5   :  { %v537_v27 = vrot.slane %v536_v13, 1 }
 0x4b6   :  { %v822_v47 = vrot.slane %v821_v6, 1 }
 0x4b7   :  { %v538_v58 = vadd.f32 %v537_v27, %v536_v13 }
 0x4b8   :  { %v823_v59 = vadd.f32 %v822_v47, %v821_v6 }
 0x4b9   :  { %904 = vpush %v538_v58 }
 0x4ba   :  { %906 = vpush %v823_v59 }
 0x4ea   :  { %s905_s1 = spop %904 }
 0x4eb   :  { %s907_s18 = spop %906 }
 0x4ec   :  { %s825_s19 = smul.f32 0.05, %s907_s18 }
 0x4ee   :  { %s826_s20 = sadd.f32 %s905_s1, %s825_s19 }
 0x4f0   :  { %828 = sst [smem:[#allocation9]] %s826_s20 }
 0x4f1   :  { %1006 = shalt.err (!%p1003_p7)
}
 0x4f2   :  { %s1017_s27 = smov [#allocation9]  }
 0x4f3   :  { %836 = dma.smem_to_hbm %s1017_s27, 16, %s1403_s5, [#allocation7]  }
 0x4f4   :  { %1009 = dma.done.wait [#allocation7], 16  }
 0x4f5   :  { %1010 = vsyncadd [#allocation7], 4294967280 }
 0x4f6   :  { %840 = sfence }
 0x4f7   :  { %841 = vsyncpa [#allocation7], 1 }
 0x4f8   :  { %842 = vsyncpa [#allocation8], 1 }

</bundles_post_ra>
